<compile_context>
chip_gen: v7x
topology: tpu7x:2x2x1
jax: 0.10.0
libtpu: 0.0.40
codegen_flags: <defaults>
</compile_context>

<pallas_src>
import jax
import jax.numpy as jnp
from jax.experimental import pallas as pl
from jax.experimental.pallas import tpu as pltpu

# ----------------------------- config ---------------------------------------
B = 2            # batch
S = 8            # sequence length
D = 32           # d_model
H = 4            # num heads
DK = 8           # d_kv per head
HDK = H * DK     # 32 (attention inner dim)
DFF = 64         # feed-forward hidden
DP = 128         # lane-padded model dim (full 128-lane vregs on load/store)
DFFP = 128       # lane-padded FFN hidden dim
EPS = 1e-6       # T5 LayerNorm eps


# ----------------------------- kernel ---------------------------------------
def t5_block_kernel(x_ref, pb_ref, am_ref, wqkv_ref, wo_ref, wi_ref, wof_ref,
                    out_ref):
    """One grid step = one batch element: full T5 encoder block."""
    f32, bf16 = jnp.float32, jnp.bfloat16
    inv_d = 1.0 / D                      # RMSNorm uses true model dim, not DP

    x = x_ref[0]                         # (S, DP) f32, lanes D..DP are zero

    # ---- self-attention sublayer --------------------------------------------
    # T5 LayerNorm == RMSNorm (no mean subtraction / bias); gain folded into wqkv.
    xn = x * jax.lax.rsqrt(jnp.sum(x * x, axis=-1, keepdims=True) * inv_d + EPS)

    # Fused Q|K|V projection: one MXU matmul, bf16 operands, f32 accumulation.
    qkv = jnp.dot(xn.astype(bf16), wqkv_ref[...],
                  preferred_element_type=f32)                      # (S, 3*HDK)

    # Split heads with one reshape+swapaxes per tensor (no slice+concat shuffles).
    q = qkv[:, 0 * HDK:1 * HDK].reshape(S, H, DK).swapaxes(0, 1)   # (H, S, DK)
    k = qkv[:, 1 * HDK:2 * HDK].reshape(S, H, DK).swapaxes(0, 1)
    v = qkv[:, 2 * HDK:3 * HDK].reshape(S, H, DK).swapaxes(0, 1)

    # Per-(batch, head) scores; T5 uses no 1/sqrt(d_kv) scaling.  Position bias
    # and additive mask are added in-kernel (kept in f32).
    scores = jnp.einsum("hqd,hkd->hqk", q.astype(bf16), k.astype(bf16),
                        preferred_element_type=f32)                # (H, S, S)
    scores = scores + pb_ref[0] + am_ref[...].reshape(1, 1, S)

    m = jnp.max(scores, axis=-1, keepdims=True)
    p = jnp.exp(scores - m)
    p = p * pl.reciprocal(jnp.sum(p, axis=-1, keepdims=True), approx=False)

    ctx = jnp.einsum("hqk,hkd->hqd", p.astype(bf16), v.astype(bf16),
                     preferred_element_type=f32)                   # (H, S, DK)
    ctx = ctx.swapaxes(0, 1).reshape(S, HDK)                       # (S, H*DK)

    x = x + jnp.dot(ctx.astype(bf16), wo_ref[...],
                    preferred_element_type=f32)                    # residual

    # ---- feed-forward sublayer (ReLU) ----------------------------------------
    xn2 = x * jax.lax.rsqrt(jnp.sum(x * x, axis=-1, keepdims=True) * inv_d + EPS)
    hid = jnp.maximum(
        jnp.dot(xn2.astype(bf16), wi_ref[...], preferred_element_type=f32), 0.0)
    x = x + jnp.dot(hid.astype(bf16), wof_ref[...],
                    preferred_element_type=f32)                    # residual

    out_ref[0] = x.astype(out_ref.dtype)                           # lane-dense store


# ----------------------------- pallas wrapper --------------------------------
@jax.jit
def t5_block_pallas(hidden_states, attention_mask, position_bias,
                    wqkv, wo, wi, wof):
    """Fused T5-block: grid over batch, per-(batch,head) attention in-kernel."""
    f32 = jnp.float32
    # Lane-dense activation slab (the only per-call prep; weights are prebuilt).
    x_pad = jnp.zeros((B, S, DP), f32).at[:, :, :D].set(hidden_states.astype(f32))

    out_pad = pl.pallas_call(
        t5_block_kernel,
        grid=(B,),
        in_specs=[
            pl.BlockSpec((1, S, DP), lambda b: (b, 0, 0)),        # activations
            pl.BlockSpec((1, H, S, S), lambda b: (0, 0, 0, 0)),   # position bias (shared)
            pl.BlockSpec((1, 1, 1, S), lambda b: (b, 0, 0, 0)),   # additive attention mask
            pl.BlockSpec((DP, 3 * HDK), lambda b: (0, 0)),        # fused Wq|Wk|Wv (ln1 folded)
            pl.BlockSpec((HDK, DP), lambda b: (0, 0)),            # Wo
            pl.BlockSpec((DP, DFFP), lambda b: (0, 0)),           # Wi (ln2 folded)
            pl.BlockSpec((DFFP, DP), lambda b: (0, 0)),           # Wo_ff
        ],
        out_specs=pl.BlockSpec((1, S, DP), lambda b: (b, 0, 0)),
        out_shape=jax.ShapeDtypeStruct((B, S, DP), f32),
        compiler_params=pltpu.CompilerParams(
            dimension_semantics=("parallel",)),                   # megacore on v7x
    )(x_pad, position_bias.astype(f32), attention_mask.astype(f32),
      wqkv, wo, wi, wof)

    return out_pad[:, :, :D].astype(hidden_states.dtype)


# --------------------- CheckpointWrapper equivalent --------------------------
class CheckpointWrapper:
    """JAX equivalent of the PyTorch CheckpointWrapper.

    Forward math is identical with or without checkpointing; when
    use_checkpoint we wrap in jax.checkpoint (remat), the JAX analogue of
    torch.utils.checkpoint.  The None->empty-tensor swap in the original is
    torch-checkpoint plumbing with no compute, hence no kernel equivalent.
    All weight preprocessing (gain folding, fusion, lane padding, bf16 cast)
    happens ONCE here, not per call.
    """

    def __init__(self, params, use_checkpoint=False):
        ln1, wq, wk, wv, wo, ln2, wi, wof = params
        f32, bf16 = jnp.float32, jnp.bfloat16
        # Fold RMSNorm gains into the first matmul of each sublayer; fuse Q|K|V.
        wqkv = jnp.concatenate([wq, wk, wv], axis=1).astype(f32) * ln1.reshape(D, 1)
        wi_f = wi.astype(f32) * ln2.reshape(D, 1)
        # Zero-padded, lane-dense, bf16 weight slabs (MXU operands).
        self.wqkv = jnp.zeros((DP, 3 * HDK), f32).at[:D, :].set(wqkv).astype(bf16)
        self.wo = jnp.zeros((HDK, DP), f32).at[:, :D].set(wo.astype(f32)).astype(bf16)
        self.wi = jnp.zeros((DP, DFFP), f32).at[:D, :DFF].set(wi_f).astype(bf16)
        self.wof = jnp.zeros((DFFP, DP), f32).at[:DFF, :D].set(wof.astype(f32)).astype(bf16)
        self.use_checkpoint = use_checkpoint

    def __call__(self, hidden_states, attention_mask, position_bias):
        def fwd(h, m, pb):
            return t5_block_pallas(h, m, pb, self.wqkv, self.wo, self.wi, self.wof)
        if self.use_checkpoint:
            # TODO(synk): training through this kernel needs a custom_vjp /
            # backward Pallas kernel; jax.checkpoint alone only sets remat policy.
            fwd = jax.checkpoint(fwd)
        out = fwd(hidden_states, attention_mask, position_bias)
        return (out, position_bias)


# ----------------------------- reference ------------------------------------
def t5_block_ref(hidden_states, attention_mask, position_bias, params):
    ln1, wq, wk, wv, wo, ln2, wi, wof = params
    x = hidden_states.astype(jnp.float32)
    xn = x * jax.lax.rsqrt(jnp.mean(x * x, -1, keepdims=True) + EPS) * ln1[0]
    q = (xn @ wq).reshape(B, S, H, DK).transpose(0, 2, 1, 3)
    k = (xn @ wk).reshape(B, S, H, DK).transpose(0, 2, 1, 3)
    v = (xn @ wv).reshape(B, S, H, DK).transpose(0, 2, 1, 3)
    scores = jnp.einsum("bhqd,bhkd->bhqk", q, k) + position_bias + attention_mask
    p = jax.nn.softmax(scores, axis=-1)
    ctx = jnp.einsum("bhqk,bhkd->bhqd", p, v).transpose(0, 2, 1, 3).reshape(B, S, H * DK)
    x = x + ctx @ wo
    xn2 = x * jax.lax.rsqrt(jnp.mean(x * x, -1, keepdims=True) + EPS) * ln2[0]
    x = x + jnp.maximum(xn2 @ wi, 0.0) @ wof
    return x


# ----------------------------- main ------------------------------------------
if __name__ == "__main__":
    key = jax.random.PRNGKey(0)
    ks = jax.random.split(key, 12)

    # Deterministic synthetic parameters (shapes from a T5 encoder block).
    ln1 = jnp.ones((1, D), jnp.float32) + 0.01 * jax.random.normal(ks[0], (1, D))
    wq = 0.05 * jax.random.normal(ks[1], (D, H * DK), jnp.float32)
    wk = 0.05 * jax.random.normal(ks[2], (D, H * DK), jnp.float32)
    wv = 0.05 * jax.random.normal(ks[3], (D, H * DK), jnp.float32)
    wo = 0.05 * jax.random.normal(ks[4], (H * DK, D), jnp.float32)
    ln2 = jnp.ones((1, D), jnp.float32) + 0.01 * jax.random.normal(ks[5], (1, D))
    wi = 0.05 * jax.random.normal(ks[6], (D, DFF), jnp.float32)
    wof = 0.05 * jax.random.normal(ks[7], (DFF, D), jnp.float32)
    params = (ln1, wq, wk, wv, wo, ln2, wi, wof)

    # Inputs.
    hidden_states = jax.random.normal(ks[8], (B, S, D), jnp.float32)
    # Additive attention mask: mask out the last 2 positions of batch 1.
    keep = jnp.ones((B, S), jnp.float32).at[1, -2:].set(0.0)
    attention_mask = ((1.0 - keep) * -1e9).reshape(B, 1, 1, S)
    position_bias = 0.1 * jax.random.normal(ks[9], (1, H, S, S), jnp.float32)

    wrapper = CheckpointWrapper(params, use_checkpoint=False)
    out, pbias = wrapper(hidden_states, attention_mask, position_bias)
    out = jax.block_until_ready(out)

    ref = t5_block_ref(hidden_states, attention_mask, position_bias, params)
    assert out.shape == (B, S, D)
    # Tolerance accounts for bf16 MXU operands (weights + activations feeding
    # the matmuls); softmax / norm / residual math stays in f32.
    assert jnp.allclose(out, ref, atol=2e-2, rtol=2e-2), "mismatch vs reference"

    print("KERNEL_OK")
</pallas_src>

<mosaic_0001>
module attributes {stable_mosaic.version = 11 : i64} {
  func.func @t5_block_kernel(%arg0: i32, %arg1: memref<1x8x128xf32, #tpu.memory_space<vmem>>, %arg2: memref<1x4x8x8xf32, #tpu.memory_space<vmem>>, %arg3: memref<1x1x1x8xf32, #tpu.memory_space<vmem>>, %arg4: memref<128x96xbf16, #tpu.memory_space<vmem>>, %arg5: memref<32x128xbf16, #tpu.memory_space<vmem>>, %arg6: memref<128x128xbf16, #tpu.memory_space<vmem>>, %arg7: memref<128x128xbf16, #tpu.memory_space<vmem>>, %arg8: memref<1x8x128xf32, #tpu.memory_space<vmem>>) attributes {dimension_semantics = [#tpu.dimension_semantics<parallel>], iteration_bounds = array<i64: 2>, scalar_prefetch = 0 : i64, scratch_operands = 0 : i64, tpu.core_type = #tpu.core_type<tc>, window_params = [{transform_indices = @transform_0, window_bounds = array<i64: 1, 8, 128>}, {pipeline_mode = #tpu.pipeline_mode<synchronous>, transform_indices = @transform_1, window_bounds = array<i64: 1, 4, 8, 8>}, {transform_indices = @transform_2, window_bounds = array<i64: 1, 1, 1, 8>}, {pipeline_mode = #tpu.pipeline_mode<synchronous>, transform_indices = @transform_3, window_bounds = array<i64: 128, 96>}, {pipeline_mode = #tpu.pipeline_mode<synchronous>, transform_indices = @transform_4, window_bounds = array<i64: 32, 128>}, {pipeline_mode = #tpu.pipeline_mode<synchronous>, transform_indices = @transform_5, window_bounds = array<i64: 128, 128>}, {pipeline_mode = #tpu.pipeline_mode<synchronous>, transform_indices = @transform_6, window_bounds = array<i64: 128, 128>}, {transform_indices = @transform_7, window_bounds = array<i64: 1, 8, 128>}]} {
    %c0 = arith.constant 0 : index
    %c0_0 = arith.constant 0 : index
    %c0_1 = arith.constant 0 : index
    %0 = vector.load %arg1[%c0, %c0_0, %c0_1] : memref<1x8x128xf32, #tpu.memory_space<vmem>>, vector<1x8x128xf32>
    %1 = vector.shape_cast %0 : vector<1x8x128xf32> to vector<8x128xf32>
    %2 = arith.mulf %1, %1 : vector<8x128xf32>
    %cst = arith.constant dense<0.000000e+00> : vector<8xf32>
    %3 = vector.multi_reduction <add>, %2, %cst [1] : vector<8x128xf32> to vector<8xf32>
    %4 = vector.shape_cast %3 : vector<8xf32> to vector<8x1xf32>
    %cst_2 = arith.constant 3.125000e-02 : f32
    %5 = vector.broadcast %cst_2 : f32 to vector<8x1xf32>
    %6 = arith.mulf %4, %5 : vector<8x1xf32>
    %cst_3 = arith.constant 9.99999997E-7 : f32
    %7 = vector.broadcast %cst_3 : f32 to vector<8x1xf32>
    %8 = arith.addf %6, %7 : vector<8x1xf32>
    %9 = math.rsqrt %8 : vector<8x1xf32>
    %10 = vector.broadcast %9 : vector<8x1xf32> to vector<8x128xf32>
    %11 = arith.mulf %1, %10 : vector<8x128xf32>
    %12 = arith.truncf %11 : vector<8x128xf32> to vector<8x128xbf16>
    %c0_4 = arith.constant 0 : index
    %c0_5 = arith.constant 0 : index
    %13 = vector.load %arg4[%c0_4, %c0_5] : memref<128x96xbf16, #tpu.memory_space<vmem>>, vector<128x96xbf16>
    %cst_6 = arith.constant dense<0.000000e+00> : vector<8x96xf32>
    %14 = tpu.matmul %12, %13, %cst_6 {dimension_numbers = #tpu.dot_dimension_numbers<[1], [0], [0], [1], [0, 0, 1, 1], [], []>} : vector<8x128xbf16>, vector<128x96xbf16>, vector<8x96xf32> -> vector<8x96xf32>
    %15 = vector.extract_strided_slice %14 {offsets = [0, 0], sizes = [8, 32], strides = [1, 1]} : vector<8x96xf32> to vector<8x32xf32>
    %16 = vector.shape_cast %15 : vector<8x32xf32> to vector<8x4x8xf32>
    %17 = tpu.transpose %16, [1, 0, 2] : vector<8x4x8xf32> -> vector<4x8x8xf32>
    %18 = vector.extract_strided_slice %14 {offsets = [0, 32], sizes = [8, 32], strides = [1, 1]} : vector<8x96xf32> to vector<8x32xf32>
    %19 = vector.shape_cast %18 : vector<8x32xf32> to vector<8x4x8xf32>
    %20 = tpu.transpose %19, [1, 0, 2] : vector<8x4x8xf32> -> vector<4x8x8xf32>
    %21 = vector.extract_strided_slice %14 {offsets = [0, 64], sizes = [8, 32], strides = [1, 1]} : vector<8x96xf32> to vector<8x32xf32>
    %22 = vector.shape_cast %21 : vector<8x32xf32> to vector<8x4x8xf32>
    %23 = tpu.transpose %22, [1, 0, 2] : vector<8x4x8xf32> -> vector<4x8x8xf32>
    %24 = arith.truncf %17 : vector<4x8x8xf32> to vector<4x8x8xbf16>
    %25 = arith.truncf %20 : vector<4x8x8xf32> to vector<4x8x8xbf16>
    "tpu.trace_start"() <{level = 10 : i32, message = "hqd,hkd->hqk"}> : () -> ()
    %cst_7 = arith.constant dense<0.000000e+00> : vector<4x8x8xf32>
    %26 = tpu.matmul %24, %25, %cst_7 {dimension_numbers = #tpu.dot_dimension_numbers<[2], [2], [1], [1], [0, 0, 0, 1, 1, 1], [0], [0]>} : vector<4x8x8xbf16>, vector<4x8x8xbf16>, vector<4x8x8xf32> -> vector<4x8x8xf32>
    "tpu.trace_stop"() : () -> ()
    %c0_8 = arith.constant 0 : index
    %c0_9 = arith.constant 0 : index
    %c0_10 = arith.constant 0 : index
    %c0_11 = arith.constant 0 : index
    %27 = vector.load %arg2[%c0_8, %c0_9, %c0_10, %c0_11] : memref<1x4x8x8xf32, #tpu.memory_space<vmem>>, vector<1x4x8x8xf32>
    %28 = vector.shape_cast %27 : vector<1x4x8x8xf32> to vector<4x8x8xf32>
    %29 = arith.addf %26, %28 : vector<4x8x8xf32>
    %c0_12 = arith.constant 0 : index
    %c0_13 = arith.constant 0 : index
    %c0_14 = arith.constant 0 : index
    %c0_15 = arith.constant 0 : index
    %30 = vector.load %arg3[%c0_12, %c0_13, %c0_14, %c0_15] : memref<1x1x1x8xf32, #tpu.memory_space<vmem>>, vector<1x1x1x8xf32>
    %31 = vector.shape_cast %30 : vector<1x1x1x8xf32> to vector<1x1x8xf32>
    %32 = vector.broadcast %31 : vector<1x1x8xf32> to vector<4x8x8xf32>
    %33 = arith.addf %29, %32 : vector<4x8x8xf32>
    %cst_16 = arith.constant dense<0xFF800000> : vector<4x8xf32>
    %34 = vector.multi_reduction <maximumf>, %33, %cst_16 [2] : vector<4x8x8xf32> to vector<4x8xf32>
    %35 = vector.shape_cast %34 : vector<4x8xf32> to vector<4x8x1xf32>
    %36 = vector.broadcast %35 : vector<4x8x1xf32> to vector<4x8x8xf32>
    %37 = arith.subf %33, %36 : vector<4x8x8xf32>
    %38 = math.exp %37 : vector<4x8x8xf32>
    %cst_17 = arith.constant dense<0.000000e+00> : vector<4x8xf32>
    %39 = vector.multi_reduction <add>, %38, %cst_17 [2] : vector<4x8x8xf32> to vector<4x8xf32>
    %40 = vector.shape_cast %39 : vector<4x8xf32> to vector<4x8x1xf32>
    %41 = tpu.reciprocal %40 : vector<4x8x1xf32> -> vector<4x8x1xf32>
    %42 = vector.broadcast %41 : vector<4x8x1xf32> to vector<4x8x8xf32>
    %43 = arith.mulf %38, %42 : vector<4x8x8xf32>
    %44 = arith.truncf %43 : vector<4x8x8xf32> to vector<4x8x8xbf16>
    %45 = arith.truncf %23 : vector<4x8x8xf32> to vector<4x8x8xbf16>
    "tpu.trace_start"() <{level = 10 : i32, message = "hqk,hkd->hqd"}> : () -> ()
    %cst_18 = arith.constant dense<0.000000e+00> : vector<4x8x8xf32>
    %46 = tpu.matmul %44, %45, %cst_18 {dimension_numbers = #tpu.dot_dimension_numbers<[2], [1], [1], [2], [0, 0, 0, 1, 1, 2], [0], [0]>} : vector<4x8x8xbf16>, vector<4x8x8xbf16>, vector<4x8x8xf32> -> vector<4x8x8xf32>
    "tpu.trace_stop"() : () -> ()
    %47 = tpu.transpose %46, [1, 0, 2] : vector<4x8x8xf32> -> vector<8x4x8xf32>
    %48 = vector.shape_cast %47 : vector<8x4x8xf32> to vector<8x32xf32>
    %49 = arith.truncf %48 : vector<8x32xf32> to vector<8x32xbf16>
    %c0_19 = arith.constant 0 : index
    %c0_20 = arith.constant 0 : index
    %50 = vector.load %arg5[%c0_19, %c0_20] : memref<32x128xbf16, #tpu.memory_space<vmem>>, vector<32x128xbf16>
    %cst_21 = arith.constant dense<0.000000e+00> : vector<8x128xf32>
    %51 = tpu.matmul %49, %50, %cst_21 {dimension_numbers = #tpu.dot_dimension_numbers<[1], [0], [0], [1], [0, 0, 1, 1], [], []>} : vector<8x32xbf16>, vector<32x128xbf16>, vector<8x128xf32> -> vector<8x128xf32>
    %52 = arith.addf %1, %51 : vector<8x128xf32>
    %53 = arith.mulf %52, %52 : vector<8x128xf32>
    %cst_22 = arith.constant dense<0.000000e+00> : vector<8xf32>
    %54 = vector.multi_reduction <add>, %53, %cst_22 [1] : vector<8x128xf32> to vector<8xf32>
    %55 = vector.shape_cast %54 : vector<8xf32> to vector<8x1xf32>
    %cst_23 = arith.constant 3.125000e-02 : f32
    %56 = vector.broadcast %cst_23 : f32 to vector<8x1xf32>
    %57 = arith.mulf %55, %56 : vector<8x1xf32>
    %cst_24 = arith.constant 9.99999997E-7 : f32
    %58 = vector.broadcast %cst_24 : f32 to vector<8x1xf32>
    %59 = arith.addf %57, %58 : vector<8x1xf32>
    %60 = math.rsqrt %59 : vector<8x1xf32>
    %61 = vector.broadcast %60 : vector<8x1xf32> to vector<8x128xf32>
    %62 = arith.mulf %52, %61 : vector<8x128xf32>
    %63 = arith.truncf %62 : vector<8x128xf32> to vector<8x128xbf16>
    %c0_25 = arith.constant 0 : index
    %c0_26 = arith.constant 0 : index
    %64 = vector.load %arg6[%c0_25, %c0_26] : memref<128x128xbf16, #tpu.memory_space<vmem>>, vector<128x128xbf16>
    %cst_27 = arith.constant dense<0.000000e+00> : vector<8x128xf32>
    %65 = tpu.matmul %63, %64, %cst_27 {dimension_numbers = #tpu.dot_dimension_numbers<[1], [0], [0], [1], [0, 0, 1, 1], [], []>} : vector<8x128xbf16>, vector<128x128xbf16>, vector<8x128xf32> -> vector<8x128xf32>
    %cst_28 = arith.constant 0.000000e+00 : f32
    %66 = vector.broadcast %cst_28 : f32 to vector<8x128xf32>
    %67 = arith.maximumf %65, %66 : vector<8x128xf32>
    %68 = arith.truncf %67 : vector<8x128xf32> to vector<8x128xbf16>
    %c0_29 = arith.constant 0 : index
    %c0_30 = arith.constant 0 : index
    %69 = vector.load %arg7[%c0_29, %c0_30] : memref<128x128xbf16, #tpu.memory_space<vmem>>, vector<128x128xbf16>
    %cst_31 = arith.constant dense<0.000000e+00> : vector<8x128xf32>
    %70 = tpu.matmul %68, %69, %cst_31 {dimension_numbers = #tpu.dot_dimension_numbers<[1], [0], [0], [1], [0, 0, 1, 1], [], []>} : vector<8x128xbf16>, vector<128x128xbf16>, vector<8x128xf32> -> vector<8x128xf32>
    %71 = arith.addf %52, %70 : vector<8x128xf32>
    %c0_32 = arith.constant 0 : index
    %c0_33 = arith.constant 0 : index
    %c0_34 = arith.constant 0 : index
    %72 = vector.load %arg8[%c0_32, %c0_33, %c0_34] : memref<1x8x128xf32, #tpu.memory_space<vmem>>, vector<1x8x128xf32>
    %73 = vector.shape_cast %72 : vector<1x8x128xf32> to vector<8x128xf32>
    %74 = vector.shape_cast %71 : vector<8x128xf32> to vector<1x8x128xf32>
    tpu.vector_store %arg8[%c0_32, %c0_33, %c0_34], %74 {strides = array<i32>} : memref<1x8x128xf32, #tpu.memory_space<vmem>>, vector<1x8x128xf32>,
    return
  }
  func.func @transform_0(%arg0: i32) -> (i32, i32, i32) {
    %c0_i32 = arith.constant 0 : i32
    %c0_i32_0 = arith.constant 0 : i32
    %c0_i32_1 = arith.constant 0 : i32
    return %arg0, %c0_i32, %c0_i32_0 : i32, i32, i32
  }
  func.func @transform_1(%arg0: i32) -> (i32, i32, i32, i32) {
    %c0_i32 = arith.constant 0 : i32
    %c0_i32_0 = arith.constant 0 : i32
    %c0_i32_1 = arith.constant 0 : i32
    %c0_i32_2 = arith.constant 0 : i32
    %c0_i32_3 = arith.constant 0 : i32
    return %c0_i32, %c0_i32_0, %c0_i32_1, %c0_i32_2 : i32, i32, i32, i32
  }
  func.func @transform_2(%arg0: i32) -> (i32, i32, i32, i32) {
    %c0_i32 = arith.constant 0 : i32
    %c0_i32_0 = arith.constant 0 : i32
    %c0_i32_1 = arith.constant 0 : i32
    %c0_i32_2 = arith.constant 0 : i32
    return %arg0, %c0_i32, %c0_i32_0, %c0_i32_1 : i32, i32, i32, i32
  }
  func.func @transform_3(%arg0: i32) -> (i32, i32) {
    %c0_i32 = arith.constant 0 : i32
    %c0_i32_0 = arith.constant 0 : i32
    %c0_i32_1 = arith.constant 0 : i32
    return %c0_i32, %c0_i32_0 : i32, i32
  }
  func.func @transform_4(%arg0: i32) -> (i32, i32) {
    %c0_i32 = arith.constant 0 : i32
    %c0_i32_0 = arith.constant 0 : i32
    %c0_i32_1 = arith.constant 0 : i32
    return %c0_i32, %c0_i32_0 : i32, i32
  }
  func.func @transform_5(%arg0: i32) -> (i32, i32) {
    %c0_i32 = arith.constant 0 : i32
    %c0_i32_0 = arith.constant 0 : i32
    %c0_i32_1 = arith.constant 0 : i32
    return %c0_i32, %c0_i32_0 : i32, i32
  }
  func.func @transform_6(%arg0: i32) -> (i32, i32) {
    %c0_i32 = arith.constant 0 : i32
    %c0_i32_0 = arith.constant 0 : i32
    %c0_i32_1 = arith.constant 0 : i32
    return %c0_i32, %c0_i32_0 : i32, i32
  }
  func.func @transform_7(%arg0: i32) -> (i32, i32, i32) {
    %c0_i32 = arith.constant 0 : i32
    %c0_i32_0 = arith.constant 0 : i32
    %c0_i32_1 = arith.constant 0 : i32
    return %arg0, %c0_i32, %c0_i32_0 : i32, i32, i32
  }
}

</mosaic_0001>

<bundles_post_ra>
// kernel: t5_block_pallas.1
= control target key start
LH: loop header
LB: loop body
LE: loop exit
PB: predicated region body
PF: predicated region fallthrough
CT: control target
= control target key end

     0   :  { %12 = vsyncpa [#allocation3], 0  ;;  %s2739_s0 = inlined_call_operand.vmem [shape: f32[2,8,128], index: 0, kind: input, shape index: {}]   ;;  %s2740_s1 = inlined_call_operand.hbm [shape: f32[1,4,8,8], index: 1, kind: input, shape index: {}]   ;;  %s2741_s2 = inlined_call_operand.vmem [shape: f32[2,1,1,8], index: 2, kind: input, shape index: {}]   ;;  %s2742_s3 = inlined_call_operand.vmem [shape: bf16[128,96], index: 3, kind: input, shape index: {}]   ;;  %s2743_s4 = inlined_call_operand.vmem [shape: bf16[32,128], index: 4, kind: input, shape index: {}]   ;;  %s2744_s5 = inlined_call_operand.vmem [shape: bf16[128,128], index: 5, kind: input, shape index: {}]   ;;  %s2745_s6 = inlined_call_operand.vmem [shape: bf16[128,128], index: 6, kind: input, shape index: {}]   ;;  %s2746_s7 = inlined_call_operand.hbm [shape: f32[2,8,128], index: 7, kind: output, shape index: {}]  }
   0x1   :  { %13 = vsyncpa [#allocation4], 0 }
   0x2   :  { %15 = vsyncpa [#allocation4 + $0x1], 0  ;;  %s2313_s24 = smov 0   ;;  %s2315_s25 = smov 0  }
   0x3   :  { %s2317_s26 = smov 0   ;;  %s2319_s27 = smov 0  }
   0x4 LB: > { %s2334_s28 = sadd.s32 4294967295, %s2255_s27   ;;  %s1833_s29 = sadd.s32 4294967294, %s2255_s27   ;;  %s2255_s27 = sphi %s2319_s27, %s2762_s27   ;;  %s2251_s26 = sphi %s2317_s26, %s2761_s26   ;;  %s2247_s25 = sphi %s2315_s25, %s2760_s25   ;;  %s2243_s24 = sphi %s2313_s24, %s2759_s24  }
   0x5   : > { %s2338_s30 = sadd.s32 1, %s2255_s27   ;;  %s185_s8 = sadd.s32 1, %s2251_s26 }
   0x6   : > { %s182_s9 = ssub.s32 %s2255_s27, %s2338_s30  ;;  %p195_p0 = scmp.ne.s32.totalorder %s2251_s26, %s2247_s25 }
   0x7   : > { %p183_p1 = scmp.eq.s32.totalorder %s182_s9, 0  ;;  %p196_p2 = scmp.eq.s32.totalorder %s2334_s28, 1 }
   0x8   : > { %p201_p3 = scmp.ne.s32.totalorder %s2247_s25, %s2243_s24  ;;  %p202_p4 = scmp.eq.s32.totalorder %s1833_s29, 1 }
   0x9   : > { %s2349_s10 = scalar_select %p183_p1, %s2251_s26, %s185_s8  }
   0xa   : > { %p2351_p5 = por %p196_p2, %p195_p0  ;;  %p2355_p6 = por %p202_p4, %p201_p3 }
   0xb   : > { %p1834_p7 = scmp.ge.s32.totalorder %s2255_s27, 1  ;;  %p209_p8 = scmp.lt.s32.totalorder %s2255_s27, 3 }
   0xc   : > { %s2750_s11 = scalar_select %p2351_p5, 1, 0 }
   0xd   : > { %s2751_s12 = scalar_select %p2355_p6, 1, 0 }
   0xe   : > { %p2747_p9 = scmp.eq.s32.totalorder %s2334_s28, 0  ;;  %p2362_p10 = pnand %p1834_p7, %p209_p8 }
   0xf   : > { %s2257_s14 = smov [#allocation2]   ;;  %s2161_s19 = scalar_lea.hbm %s2740_s1, 512 }
  0x10   : > { %s2752_s13 = scalar_select %p2362_p10, 1, 0 }
  0x11   : > { %s221_s15 = sshll.u32 %s2257_s14, 4  ;;  %p2057_p11 = pneg %p2362_p10  ;;  %s222_s15 = int_to_ptr.vmem [resolvable:$true] %s221_s15 }
  0x12   : > { %p2162_p13 = scmp.ne.s32.totalorder %s2740_s1, %s2161_s19  ;;  %p2168_p3 = scmp.lt.u32.totalorder %s2161_s19, %s2740_s1 }
  0x13   : > { %p2370_p12 = pnand %p2747_p9, %p2057_p11 }
  0x15   : > { %p2163_p0 = pneg %p2370_p12 }
  0x17   : > { %p2164_p1 = pnand %p2163_p0, %p2162_p13 }
  0x19   : > { %p2165_p2 = pneg %p2164_p1 }
  0x1b   : > { %p2170_p4 = pnand %p2168_p3, %p2165_p2 }
  0x1d   : > { %2173 = shalt.err (!%p2170_p4)
}
  0x1e   : > { %s2174_s29 = scalar_lea.vmem %s222_s15, 512  ;;  %p2182_p9 = scmp.lt.s32.totalorder %s222_s15, %s222_s15 }
  0x1f   : > { %p2175_p7 = scmp.ne.s32.totalorder %s222_s15, %s2174_s29  ;;  %p2183_p6 = scmp.lt.s32.totalorder %s2174_s29, %s2174_s29 }
  0x21   : > { %p2177_p8 = pnand %p2175_p7, %p2163_p0  ;;  %p2184_p5 = por %p2183_p6, %p2182_p9 }
  0x23   : > { %p2178_p11 = pneg %p2177_p8 }
  0x25   : > { %p2185_p10 = pnand %p2184_p5, %p2178_p11 }
  0x27   : > { %2188 = shalt.err (!%p2185_p10)
}
  0x28   : > { %s2258_s8 = smov 128   ;;  %s2259_s9 = smov 8  }
  0x29   : > { %2060 = dma.hbm_to_vmem [thread:$0]  (!%p2370_p12), %s2740_s1, 512, %s222_s15, [#allocation3], %s2258_s8, %s2258_s8, %s2259_s9  }
  0x2a   : > { %p2754_p13 = scmp.ne.s32.totalorder %s2752_s13, 0 }
  0x2b   : > { %p2755_p1 = scmp.eq.s32.totalorder (!%p2754_p13), %s2334_s28, 0 }
  0x2c   : > { %262 = sbr.rel (%p2754_p13) target bundleno = 2466 (0x9a2), region = 48 }
  0x33   : > { %2234 = dma.done.wait (%p2755_p1), [#allocation3], 512   ;;  %p2756_p0 = pmov %p2755_p1 }
  0x34   : > { %p296_p5 = scmp.lt.s32.totalorder %s2334_s28, 1  ;;  %v2260_v0 = vmov 0.0   ;;  %v2115_v3 = vld [vmem:[%s2742_s3] sm:$0xff]   ;;  %v2116_v4 = vld [vmem:[%s2742_s3 + $0x8] sm:$0xff]   ;;  %v2117_v5 = vld [vmem:[%s2742_s3 + $0x10] sm:$0xff]   ;;  %vm2261_vm0 = vmmov 0   ;;  %v432_v26 = vlaneseq }
  0x35   : > { %2236 = vsyncadd (%p2756_p0), [#allocation3], 4294966784  ;;  %1935 = vmatprep.subr.bf16.mxu0 %v2260_v0  ;;  %1955 = vmatprep.subr.bf16.mxu1 %v2260_v0  ;;  %v2118_v6 = vld [vmem:[%s2742_s3 + $0x18] sm:$0xff]   ;;  %v2119_v7 = vld [vmem:[%s2742_s3 + $0x20] sm:$0xff]   ;;  %s2262_s23 = smov 112   ;;  %s2263_s29 = smov 120  }
  0x36   : > { %s2400_s16 = scalar_select %p296_p5, %s2334_s28, 1  ;;  %1936 = vmatpush3.bf16.msra.mxu0 %v2115_v3  ;;  %v2120_v8 = vld [vmem:[%s2742_s3 + $0x28] sm:$0xff]   ;;  %1951 = vmatprep.mubr.msk.bf16.mxu0 %vm2261_vm0, %v2260_v0  ;;  %v2121_v9 = vld [vmem:[%s2742_s3 + $0x30] sm:$0xff]   ;;  %v2122_v10 = vld [vmem:[%s2742_s3 + $0x38] sm:$0xff]   ;;  %v2266_v24 = vmov 1983009808  }
  0x37   : > { %1937 = vmatprep.subr.bf16.mxu0 %v2260_v0  ;;  %1957 = vmatprep.mubr.msk.bf16.mxu1 %vm2261_vm0, %v2260_v0  ;;  %s2264_s8 = smov 104   ;;  %s2265_s9 = smov 96   ;;  %v430_v25 = vunpack.c.l.s4 %v2266_v24  ;;  %v433_v28 = vshrl.u32 %v432_v26, 7  ;;  %v2267_v30 = vmov 1934713408   ;;  %vm871_vm1 = vcmask 64512  }
  0x38   : > { %s1840_s15 = sshll.u32 %s2400_s16, 3  ;;  %v462_v31 = vunpack.c.l.s4 %v2267_v30  ;;  %vm1122_vm2 = vcmask 1043456   ;;  %s2269_s21 = smov 16   ;;  %vm1453_vm3 = vcmask 130048   ;;  %vm1455_vm4 = vcmask 195584  }
  0x39   : > { %s299_s19 = scalar_lea.vmem %s2739_s0, %s1840_s15  ;;  %v431_v27 = vunpack.c.0.s8 %v430_v25  ;;  %s302_s15 = scalar_lea.vmem %s2741_s2, %s2400_s16  ;;  %vm1474_vm5 = vcmask 261120  }
  0x3a   : > { %v2406_v1 = vld [vmem:[%s299_s19] sm:$0xff]  ;;  %1938 = vmatpush3.bf16.msra.mxu0 %v2116_v4  ;;  %v463_v38 = vunpack.c.0.s8 %v462_v31  ;;  %s2268_s16 = smov 64   ;;  %s2270_s22 = smov 8  }
  0x3b   : > { %v305_v2 = vmul.f32 %v2406_v1, %v2406_v1  ;;  %1939 = vmatprep.subr.bf16.mxu0 %v2260_v0  ;;  %v2468_v34 = vsub.s32 %v431_v27, %v433_v28  ;;  %s293_s17 = sand.u32 1, %s2247_s25   ;;  %p2757_p9 = scmp.ne.s32.totalorder %s2750_s11, 0 }
  0x3c   : > { %v2478_v44 = vsub.s32 %v463_v38, %v433_v28 }
  0x3d   : > { %306 = vadd.xlane.f32.xlu0 %v305_v2 }
  0x3e   : > { %1940 = vmatpush3.bf16.msra.mxu0 %v2117_v5 }
  0x3f   : > { %1941 = vmatprep.subr.bf16.mxu0 %v2260_v0 }
  0x42   : > { %1942 = vmatpush3.bf16.msra.mxu0 %v2118_v6 }
  0x43   : > { %1943 = vmatprep.subr.bf16.mxu0 %v2260_v0 }
  0x46   : > { %1944 = vmatpush3.bf16.msra.mxu0 %v2119_v7 }
  0x47   : > { %1945 = vmatprep.subr.bf16.mxu0 %v2260_v0 }
  0x4a   : > { %1946 = vmatpush3.bf16.msra.mxu0 %v2120_v8 }
  0x4b   : > { %1947 = vmatprep.subr.bf16.mxu0 %v2260_v0 }
  0x4e   : > { %1948 = vmatpush3.bf16.msra.mxu0 %v2121_v9 }
  0x4f   : > { %1949 = vmatprep.subr.bf16.mxu0 %v2260_v0 }
  0x52   : > { %1950 = vmatpush3.bf16.msra.mxu0 %v2122_v10 }
  0x53   : > { %1979 = vmatprep.subr.bf16.mxu0 %v2260_v0 }
  0xca   : > { %v307_v11 = vpop.xlane.xlu0 %306 }
  0xcb   : > { %v308_v12 = vmul.f32 0.03125, %v307_v11 }
  0xcd   : > { %v309_v13 = vadd.f32 1e-06, %v308_v12 }
  0xcf   : > { %2141 = vrsqrt.f32 %v309_v13 }
  0xd9   : > { %v2142_v14 = vpop.eup %2141 }
  0xda   : > { %v311_v15 = vmul.f32 %v2142_v14, %v2406_v1 }
  0xdc   : > { %v312_v16 = vpack.c.bf16 %v311_v15, %v311_v15 }
  0xde   : > { %1952 = vmatmul.mubr.bf16.vlgmr.msra.gmra.mrb[0].mxu0 %v312_v16 }
  0xdf   : > { %1981 = vmatprep.mubr.msk.bf16.mxu0 %vm2261_vm0, %v2260_v0 }
 0x1b1   : > { %v2449_v17 = vpop.f32.mrb[0].mxu0 }
 0x1b2   : > { %421 = vrot.lane.b32.xlu1 %v2449_v17, %s2262_s23  ;;  %418 = vrot.lane.b32.xlu0 %v2449_v17, %s2263_s29  ;;  %v1953_v18 = vpop.f32.mrb[1].mxu0  ;;  %s2271_s23 = smov 24  }
 0x1b3   : > { %v414_v19 = vpop.f32.mrb[2].mxu0 }
 0x1b4   : > { %v1954_v20 = vpop.f32.mrb[3].mxu0 }
 0x1b6   : > { %424 = vrot.lane.b32.xlu1 %v2449_v17, %s2264_s8 }
 0x1ba   : > { %563 = vrot.lane.b32.xlu1 %v2449_v17, %s2265_s9 }
 0x224   : > { %v2455_v21 = vpop.permute.xlu0 %418  ;;  %v2458_v22 = vpop.permute.xlu1 %421 }
 0x225   : > { %565 = vrot.lane.b32.xlu1 %v2455_v21, %s2265_s9  ;;  %v427_v35 = vcombine.low %v2449_v17, %v2458_v22  ;;  %v428_v36 = vcombine.high %v2449_v17, %v2458_v22 }
 0x227   : > { %v435_v41 = vrot.slane %v427_v35, %v2468_v34  ;;  %v442_v42 = vrot.slane %v428_v36, %v2468_v34 }
 0x228   : > { %v2461_v23 = vpop.permute.xlu1 %424 }
 0x229   : > { %567 = vrot.lane.b32.xlu1 %v2458_v22, %s2265_s9  ;;  %v443_v32 = vcombine.low %v2455_v21, %v2461_v23  ;;  %v444_v33 = vcombine.high %v2455_v21, %v2461_v23 }
 0x22b   : > { %v451_v39 = vrot.slane %v443_v32, %v2468_v34  ;;  %v458_v40 = vrot.slane %v444_v33, %v2468_v34 }
 0x22c   : > { %v564_v29 = vpop.permute.xlu1 %563 }
 0x22d   : > { %569 = vrot.lane.b32.xlu1 %v2461_v23, %s2265_s9  ;;  %v459_v45 = vcombine.low %v435_v41, %v451_v39  ;;  %v460_v46 = vcombine.high %v435_v41, %v451_v39  ;;  %v475_v47 = vcombine.low %v442_v42, %v458_v40  ;;  %v476_v48 = vcombine.high %v442_v42, %v458_v40 }
 0x22f   : > { %v467_v54 = vrot.slane %v459_v45, %v2478_v44  ;;  %v474_v55 = vrot.slane %v460_v46, %v2478_v44  ;;  %v483_v56 = vrot.slane %v475_v47, %v2478_v44  ;;  %v490_v57 = vrot.slane %v476_v48, %v2478_v44 }
 0x231   : > { %v495_v4 = vcombine.low %v467_v54, %v474_v55  ;;  %v1849_v5 = vcombine.high %v467_v54, %v474_v55  ;;  %v511_v6 = vcombine.low %v483_v56, %v490_v57  ;;  %v1850_v7 = vcombine.high %v483_v56, %v490_v57 }
 0x233   : > { %v502_v16 = vrot.slane %v495_v4, %v2468_v34  ;;  %v510_v18 = vrot.slane %v1849_v5, %v2468_v34  ;;  %v518_v19 = vrot.slane %v511_v6, %v2468_v34  ;;  %v526_v20 = vrot.slane %v1850_v7, %v2468_v34  ;;  %v867_v4 = vld [vmem:[#allocation2] sm:$0xff]  ;;  %v1859_v6 = vld [vmem:[%s302_s15] ss:$0 sm:$0xff]  ;;  %s1839_s15 = sshll.u32 %s293_s17, 3 }
 0x234   : > { %s295_s13 = scalar_lea.vmem [#allocation5], %s1839_s15 }
 0x235   : > { %v527_v32 = vcombine.low %v502_v16, %v510_v18  ;;  %v543_v33 = vcombine.low %v518_v19, %v526_v20  ;;  %s1753_s18 = sshll.u32 %s295_s13, 4  ;;  %s2699_s18 = int_to_ptr.vmem [resolvable:$true] %s1753_s18 }
 0x237   : > { %v551_v38 = vrot.slane %v543_v33, %v2478_v44  ;;  %v870_v33 = vld [vmem:[#allocation2 + $0x18] sm:$0xff] }
 0x297   : > { %v566_v37 = vpop.permute.xlu1 %565 }
 0x29b   : > { %v568_v43 = vpop.permute.xlu1 %567 }
 0x29c   : > { %v575_v49 = vcombine.low %v564_v29, %v568_v43  ;;  %v576_v50 = vcombine.high %v564_v29, %v568_v43 }
 0x29e   : > { %v583_v58 = vrot.slane %v575_v49, %v2468_v34  ;;  %v590_v59 = vrot.slane %v576_v50, %v2468_v34 }
 0x29f   : > { %v570_v51 = vpop.permute.xlu1 %569 }
 0x2a0   : > { %v591_v52 = vcombine.low %v566_v37, %v570_v51  ;;  %v592_v53 = vcombine.high %v566_v37, %v570_v51  ;;  %v535_v37 = vrot.slane %v527_v32, %v2478_v44  ;;  %v528_v51 = vcombine.high %v502_v16, %v510_v18 }
 0x2a2   : > { %v599_v60 = vrot.slane %v591_v52, %v2468_v34  ;;  %v606_v61 = vrot.slane %v592_v53, %v2468_v34  ;;  %v559_v43 = vcombine.low %v535_v37, %v551_v38  ;;  %v544_v52 = vcombine.high %v518_v19, %v526_v20 }
 0x2a3   : > { %v560_v53 = vcombine.high %v535_v37, %v551_v38  ;;  %v542_v56 = vrot.slane %v528_v51, %v2478_v44 }
 0x2a4   : > { %v607_v62 = vcombine.low %v583_v58, %v599_v60  ;;  %v608_v63 = vcombine.high %v583_v58, %v599_v60  ;;  %v623_v2 = vcombine.low %v590_v59, %v606_v61  ;;  %v624_v3 = vcombine.high %v590_v59, %v606_v61 }
 0x2a5   : > { %v859_v48 = vpack.c.bf16 %v559_v43, %v559_v43  ;;  %v860_v55 = vpack.c.bf16 %v560_v53, %v560_v53  ;;  %v558_v57 = vrot.slane %v544_v52, %v2478_v44 }
 0x2a6   : > { %v615_v8 = vrot.slane %v607_v62, %v2478_v44  ;;  %v622_v9 = vrot.slane %v608_v63, %v2478_v44  ;;  %v631_v10 = vrot.slane %v623_v2, %v2478_v44  ;;  %v638_v11 = vrot.slane %v624_v3, %v2478_v44 }
 0x2a7   : > { %v561_v60 = vcombine.low %v542_v56, %v558_v57  ;;  %v562_v2 = vcombine.high %v542_v56, %v558_v57 }
 0x2a8   : > { %v643_v12 = vcombine.low %v615_v8, %v622_v9  ;;  %v1851_v13 = vcombine.high %v615_v8, %v622_v9  ;;  %v659_v14 = vcombine.low %v631_v10, %v638_v11  ;;  %v1852_v15 = vcombine.high %v631_v10, %v638_v11 }
 0x2a9   : > { %v861_v62 = vpack.c.bf16 %v561_v60, %v561_v60  ;;  %v862_v3 = vpack.c.bf16 %v562_v2, %v562_v2 }
 0x2aa   : > { %v650_v24 = vrot.slane %v643_v12, %v2468_v34  ;;  %v658_v25 = vrot.slane %v1851_v13, %v2468_v34  ;;  %v666_v26 = vrot.slane %v659_v14, %v2468_v34  ;;  %v674_v27 = vrot.slane %v1852_v15, %v2468_v34  ;;  %v868_v13 = vld [vmem:[#allocation2 + $0x8] sm:$0xff] }
 0x2ac   : > { %v675_v28 = vcombine.low %v650_v24, %v658_v25  ;;  %v691_v29 = vcombine.low %v666_v26, %v674_v27  ;;  %v676_v41 = vcombine.high %v650_v24, %v658_v25  ;;  %v692_v42 = vcombine.high %v666_v26, %v674_v27  ;;  %v869_v25 = vld [vmem:[#allocation2 + $0x10] sm:$0xff] }
 0x2ae   : > { %v683_v30 = vrot.slane %v675_v28, %v2478_v44  ;;  %v699_v31 = vrot.slane %v691_v29, %v2478_v44  ;;  %v690_v46 = vrot.slane %v676_v41, %v2478_v44  ;;  %v706_v47 = vrot.slane %v692_v42, %v2478_v44 }
 0x2b0   : > { %v707_v35 = vcombine.low %v683_v30, %v699_v31  ;;  %v708_v40 = vcombine.high %v683_v30, %v699_v31  ;;  %v709_v50 = vcombine.low %v690_v46, %v706_v47  ;;  %v710_v59 = vcombine.high %v690_v46, %v706_v47 }
 0x2b2   : > { %v863_v36 = vpack.c.bf16 %v707_v35, %v707_v35  ;;  %v864_v45 = vpack.c.bf16 %v708_v40, %v708_v40  ;;  %v865_v54 = vpack.c.bf16 %v709_v50, %v709_v50  ;;  %v866_v61 = vpack.c.bf16 %v710_v59, %v710_v59 }
 0x2b4   : > { %v876_v39 = vsel %vm871_vm1, %v863_v36, 0  ;;  %v922_v49 = vsel %vm871_vm1, %v864_v45, 0  ;;  %v968_v58 = vsel %vm871_vm1, %v865_v54, 0  ;;  %v1014_v63 = vsel %vm871_vm1, %v866_v61, 0 }
 0x2b5   : > { %1956 = vmatpush3.bf16.xpose.msra.mxu1 %v876_v39 }
 0x2b6   : > { %1961 = vmatprep.subr.bf16.mxu1 %v2260_v0 }
 0x2bc   : > { %1958 = vmatmul.mubr.msk.bf16.vlgmr.msra.gmra.mrb[0].mxu1 %vm871_vm1, %v859_v48 }
 0x2bd   : > { %1962 = vmatpush3.bf16.xpose.msra.mxu1 %v922_v49  ;;  %1963 = vmatprep.mubr.msk.bf16.mxu1 %vm2261_vm0, %v2260_v0 }
 0x2be   : > { %1967 = vmatprep.subr.bf16.mxu1 %v2260_v0 }
 0x2c4   : > { %1964 = vmatmul.mubr.msk.bf16.vlgmr.msra.gmra.mrb[4].mxu1 %vm871_vm1, %v860_v55 }
 0x2c5   : > { %1968 = vmatpush3.bf16.xpose.msra.mxu1 %v968_v58  ;;  %1969 = vmatprep.mubr.msk.bf16.mxu1 %vm2261_vm0, %v2260_v0 }
 0x2c6   : > { %1973 = vmatprep.subr.bf16.mxu1 %v2260_v0 }
 0x2cc   : > { %1970 = vmatmul.mubr.msk.bf16.vlgmr.msra.gmra.mrb[8].mxu1 %vm871_vm1, %v861_v62 }
 0x2cd   : > { %1974 = vmatpush3.bf16.xpose.msra.mxu1 %v1014_v63  ;;  %1975 = vmatprep.mubr.msk.bf16.mxu1 %vm2261_vm0, %v2260_v0 }
 0x2ce   : > { %1985 = vmatprep.subr.bf16.mxu1 %v2260_v0 }
 0x2d4   : > { %1976 = vmatmul.mubr.msk.bf16.vlgmr.msra.gmra.mrb[12].mxu1 %vm871_vm1, %v862_v3 }
 0x2d5   : > { %1987 = vmatprep.mubr.msk.bf16.mxu1 %vm2261_vm0, %v2260_v0 }
 0x38f   : > { %v912_v5 = vpop.f32.mrb[0].mxu1 }
 0x390   : > { %v913_v7 = vadd.f32 %v912_v5, %v867_v4  ;;  %v1959_v8 = vpop.f32.mrb[1].mxu1 }
 0x391   : > { %v915_v9 = vpop.f32.mrb[2].mxu1 }
 0x392   : > { %v1960_v10 = vpop.f32.mrb[3].mxu1  ;;  %v1063_v11 = vadd.f32 %v1859_v6, %v913_v7 }
 0x394   : > { %v1067_v12 = vsel %vm871_vm1, %v1063_v11, -inf }
 0x395   : > { %1068 = vmax.xlane.f32.xlu1 %v1067_v12 }
 0x397   : > { %v958_v14 = vpop.f32.mrb[4].mxu1 }
 0x398   : > { %v959_v15 = vadd.f32 %v958_v14, %v868_v13  ;;  %v1965_v16 = vpop.f32.mrb[5].mxu1 }
 0x399   : > { %v961_v18 = vpop.f32.mrb[6].mxu1 }
 0x39a   : > { %v1966_v19 = vpop.f32.mrb[7].mxu1  ;;  %v1064_v20 = vadd.f32 %v1859_v6, %v959_v15 }
 0x39c   : > { %v1070_v24 = vsel %vm871_vm1, %v1064_v20, -inf }
 0x39d   : > { %1071 = vmax.xlane.f32.xlu0 %v1070_v24 }
 0x39f   : > { %v1004_v26 = vpop.f32.mrb[8].mxu1 }
 0x3a0   : > { %v1005_v27 = vadd.f32 %v1004_v26, %v869_v25  ;;  %v1971_v28 = vpop.f32.mrb[9].mxu1 }
 0x3a1   : > { %v1007_v29 = vpop.f32.mrb[10].mxu1 }
 0x3a2   : > { %v1972_v30 = vpop.f32.mrb[11].mxu1  ;;  %v1065_v31 = vadd.f32 %v1859_v6, %v1005_v27 }
 0x3a4   : > { %v1073_v32 = vsel %vm871_vm1, %v1065_v31, -inf }
 0x3a5   : > { %1074 = vmax.xlane.f32.xlu0 %v1073_v32 }
 0x3a7   : > { %v1050_v35 = vpop.f32.mrb[12].mxu1 }
 0x3a8   : > { %v1051_v36 = vadd.f32 %v1050_v35, %v870_v33  ;;  %v1977_v37 = vpop.f32.mrb[13].mxu1 }
 0x3a9   : > { %v1053_v38 = vpop.f32.mrb[14].mxu1 }
 0x3aa   : > { %v1978_v39 = vpop.f32.mrb[15].mxu1  ;;  %v1066_v40 = vadd.f32 %v1859_v6, %v1051_v36 }
 0x3ac   : > { %v1076_v41 = vsel %vm871_vm1, %v1066_v40, -inf }
 0x3ad   : > { %1077 = vmax.xlane.f32.xlu1 %v1076_v41 }
 0x3bb   : > { %711 = vrot.lane.b32.xlu0 %v2449_v17, %s2268_s16 }
 0x3be   : > { %713 = vrot.lane.b32.xlu1 %v2455_v21, %s2268_s16 }
 0x422   : > { %v1069_v42 = vpop.xlane.xlu1 %1068 }
 0x423   : > { %v1079_v43 = vsub.f32 %v1063_v11, %v1069_v42 }
 0x425   : > { %v1083_v45 = vmul.f32 1.442695, %v1079_v43 }
 0x427   : > { %2143 = vpow2.f32 %v1083_v45 }
 0x42a   : > { %v1072_v46 = vpop.xlane.xlu0 %1071 }
 0x42b   : > { %v1080_v47 = vsub.f32 %v1064_v20, %v1072_v46 }
 0x42d   : > { %v1085_v48 = vmul.f32 1.442695, %v1080_v47 }
 0x42f   : > { %2145 = vpow2.f32 %v1085_v48 }
 0x431   : > { %v2538_v49 = vpop.eup %2143 }
 0x432   : > { %v1091_v50 = vsel %vm871_vm1, %v2538_v49, 0.0  ;;  %v1075_v54 = vpop.xlane.xlu0 %1074 }
 0x433   : > { %1092 = vadd.xlane.f32.xlu0 %v1091_v50  ;;  %v1081_v55 = vsub.f32 %v1065_v31, %v1075_v54 }
 0x435   : > { %v1087_v56 = vmul.f32 1.442695, %v1081_v55 }
 0x439   : > { %v2542_v51 = vpop.eup %2145 }
 0x43a   : > { %v1094_v17 = vsel %vm871_vm1, %v2542_v51, 0.0  ;;  %v1078_v21 = vpop.xlane.xlu1 %1077 }
 0x43b   : > { %1095 = vadd.xlane.f32.xlu1 %v1094_v17  ;;  %v1082_v52 = vsub.f32 %v1066_v40, %v1078_v21 }
 0x43d   : > { %v1089_v53 = vmul.f32 1.442695, %v1082_v52 }
 0x43e   : > { %v714_v61 = vpop.permute.xlu1 %713 }
 0x43f   : > { %2147 = vpow2.f32 %v1089_v53 }
 0x440   : > { %2149 = vpow2.f32 %v1087_v56 }
 0x449   : > { %717 = vrot.lane.b32.xlu0 %v2461_v23, %s2268_s16  ;;  %v2548_v57 = vpop.eup %2147 }
 0x44a   : > { %v1100_v58 = vsel %vm871_vm1, %v2548_v57, 0.0  ;;  %v2552_v59 = vpop.eup %2149 }
 0x44b   : > { %v1097_v23 = vsel %vm871_vm1, %v2552_v59, 0.0 }
 0x44c   : > { %715 = vrot.lane.b32.xlu1 %v2458_v22, %s2268_s16  ;;  %v712_v22 = vpop.permute.xlu0 %711  ;;  %s1886_s16 = sshll.u32 %s2334_s28, 7  ;;  %s1740_s28 = scalar_lea.sflag [#allocation4], %s293_s17 }
 0x468   : > { %1101 = vadd.xlane.f32.xlu0 %v1100_v58 }
 0x470   : > { %1098 = vadd.xlane.f32.xlu1 %v1097_v23 }
 0x4c0   : > { %v1093_v60 = vpop.xlane.xlu0 %1092 }
 0x4c1   : > { %2151 = vrcp.f32 %v1093_v60 }
 0x4c4   : > { %v718_v62 = vpop.permute.xlu0 %717 }
 0x4c5   : > { %v739_v2 = vcombine.low %v714_v61, %v718_v62  ;;  %v740_v3 = vcombine.high %v714_v61, %v718_v62 }
 0x4c7   : > { %v747_v7 = vrot.slane %v739_v2, %v2468_v34  ;;  %v754_v8 = vrot.slane %v740_v3, %v2468_v34 }
 0x4c8   : > { %v1096_v63 = vpop.xlane.xlu1 %1095 }
 0x4c9   : > { %2153 = vrcp.f32 %v1096_v63 }
 0x4cb   : > { %v2152_v36 = vpop.eup %2151 }
 0x4cc   : > { %v716_v4 = vpop.permute.xlu1 %715  ;;  %v1107_v47 = vmul.f32 %v2152_v36, %v2538_v49 }
 0x4cd   : > { %v723_v5 = vcombine.low %v712_v22, %v716_v4  ;;  %v724_v6 = vcombine.high %v712_v22, %v716_v4 }
 0x4ce   : > { %v1111_v55 = vpack.c.bf16 %v1107_v47, %v1107_v47 }
 0x4cf   : > { %v731_v9 = vrot.slane %v723_v5, %v2468_v34  ;;  %v738_v10 = vrot.slane %v724_v6, %v2468_v34 }
 0x4d1   : > { %v755_v11 = vcombine.low %v731_v9, %v747_v7  ;;  %v756_v12 = vcombine.high %v731_v9, %v747_v7  ;;  %v771_v13 = vcombine.low %v738_v10, %v754_v8  ;;  %v772_v14 = vcombine.high %v738_v10, %v754_v8 }
 0x4d3   : > { %v763_v15 = vrot.slane %v755_v11, %v2478_v44  ;;  %v770_v16 = vrot.slane %v756_v12, %v2478_v44  ;;  %v779_v18 = vrot.slane %v771_v13, %v2478_v44  ;;  %v786_v19 = vrot.slane %v772_v14, %v2478_v44  ;;  %v2154_v41 = vpop.eup %2153 }
 0x4d4   : > { %v1108_v48 = vmul.f32 %v2154_v41, %v2542_v51 }
 0x4d5   : > { %v791_v20 = vcombine.low %v763_v15, %v770_v16  ;;  %v1853_v24 = vcombine.high %v763_v15, %v770_v16  ;;  %v807_v25 = vcombine.low %v779_v18, %v786_v19  ;;  %v1854_v26 = vcombine.high %v779_v18, %v786_v19 }
 0x4d6   : > { %v1112_v56 = vpack.c.bf16 %v1108_v48, %v1108_v48 }
 0x4d7   : > { %v798_v27 = vrot.slane %v791_v20, %v2468_v34  ;;  %v806_v28 = vrot.slane %v1853_v24, %v2468_v34  ;;  %v814_v29 = vrot.slane %v807_v25, %v2468_v34  ;;  %v822_v30 = vrot.slane %v1854_v26, %v2468_v34 }
 0x4d9   : > { %v823_v31 = vcombine.low %v798_v27, %v806_v28  ;;  %v839_v32 = vcombine.low %v814_v29, %v822_v30  ;;  %v824_v33 = vcombine.high %v798_v27, %v806_v28  ;;  %v840_v35 = vcombine.high %v814_v29, %v822_v30  ;;  %v2123_v29 = vld [vmem:[%s2743_s4] sm:$0xff]  }
 0x4db   : > { %v831_v37 = vrot.slane %v823_v31, %v2478_v44  ;;  %v847_v38 = vrot.slane %v839_v32, %v2478_v44  ;;  %v838_v39 = vrot.slane %v824_v33, %v2478_v44  ;;  %v854_v40 = vrot.slane %v840_v35, %v2478_v44 }
 0x4dd   : > { %v855_v42 = vcombine.low %v831_v37, %v847_v38  ;;  %v856_v43 = vcombine.high %v831_v37, %v847_v38  ;;  %v857_v45 = vcombine.low %v838_v39, %v854_v40  ;;  %v858_v46 = vcombine.high %v838_v39, %v854_v40  ;;  %v2124_v39 = vld [vmem:[%s2743_s4 + $0x8] sm:$0xff]  }
 0x4df   : > { %v1115_v50 = vpack.c.bf16 %v855_v42, %v855_v42  ;;  %v1116_v17 = vpack.c.bf16 %v856_v43, %v856_v43  ;;  %v1117_v53 = vpack.c.bf16 %v857_v45, %v857_v45  ;;  %v1118_v54 = vpack.c.bf16 %v858_v46, %v858_v46 }
 0x4e1   : > { %v1124_v21 = vsel %vm1122_vm2, %v1115_v50, 0  ;;  %v1170_v52 = vsel %vm1122_vm2, %v1116_v17, 0  ;;  %v1216_v49 = vsel %vm1122_vm2, %v1117_v53, 0  ;;  %v1262_v51 = vsel %vm1122_vm2, %v1118_v54, 0 }
 0x4e2   : > { %1980 = vmatpush3.bf16.msra.mxu0 %v1124_v21  ;;  %1986 = vmatpush3.bf16.msra.mxu1 %v1170_v52 }
 0x4e3   : > { %1991 = vmatprep.subr.bf16.mxu0 %v2260_v0  ;;  %1997 = vmatprep.subr.bf16.mxu1 %v2260_v0 }
 0x4e5   : > { %1982 = vmatmul.mubr.msk.bf16.vlgmr.msra.gmra.mrb[4].mxu0 %vm871_vm1, %v1111_v55  ;;  %1988 = vmatmul.mubr.msk.bf16.vlgmr.msra.gmra.mrb[16].mxu1 %vm871_vm1, %v1112_v56 }
 0x4e6   : > { %1992 = vmatpush3.bf16.msra.mxu0 %v1216_v49  ;;  %1998 = vmatpush3.bf16.msra.mxu1 %v1262_v51 }
 0x4e7   : > { %1999 = vmatprep.mubr.msk.bf16.mxu1 %vm2261_vm0, %v2260_v0  ;;  %1993 = vmatprep.mubr.msk.bf16.mxu0 %vm2261_vm0, %v2260_v0 }
 0x4e8   : > { %2003 = vmatprep.subr.bf16.mxu0 %v2260_v0  ;;  %2011 = vmatprep.subr.bf16.mxu1 %v2260_v0 }
 0x4f5   : > { %v1102_v58 = vpop.xlane.xlu0 %1101 }
 0x4f6   : > { %2155 = vrcp.f32 %v1102_v58 }
 0x4fd   : > { %v1099_v23 = vpop.xlane.xlu1 %1098 }
 0x4fe   : > { %2157 = vrcp.f32 %v1099_v23 }
 0x500   : > { %v2156_v22 = vpop.eup %2155 }
 0x501   : > { %v1110_v60 = vmul.f32 %v2156_v22, %v2548_v57 }
 0x503   : > { %v1114_v61 = vpack.c.bf16 %v1110_v60, %v1110_v60 }
 0x505   : > { %2000 = vmatmul.mubr.msk.bf16.vlgmr.msra.gmra.mrb[20].mxu1 %vm871_vm1, %v1114_v61 }
 0x506   : > { %2027 = vmatprep.mubr.msk.bf16.mxu1 %vm2261_vm0, %v2260_v0 }
 0x508   : > { %v2158_v62 = vpop.eup %2157 }
 0x509   : > { %v1109_v63 = vmul.f32 %v2158_v62, %v2552_v59 }
 0x50b   : > { %v1113_v2 = vpack.c.bf16 %v1109_v63, %v1109_v63 }
 0x50d   : > { %1994 = vmatmul.mubr.msk.bf16.vlgmr.msra.gmra.mrb[8].mxu0 %vm871_vm1, %v1113_v2  ;;  %v2125_v2 = vld [vmem:[%s2744_s5] sm:$0xff]  }
 0x50e   : > { %2007 = vmatprep.mubr.msk.bf16.mxu0 %vm2261_vm0, %v2260_v0  ;;  %2004 = vmatpush3.bf16.msra.mxu0 %v2123_v29 }
 0x50f   : > { %2005 = vmatprep.subr.bf16.mxu0 %v2260_v0  ;;  %2012 = vmatpush3.bf16.msra.mxu1 %v2125_v2 }
 0x510   : > { %2013 = vmatprep.subr.bf16.mxu1 %v2260_v0 }
 0x512   : > { %2006 = vmatpush3.bf16.msra.mxu0 %v2124_v39 }
 0x513   : > { %2031 = vmatprep.subr.bf16.mxu0 %v2260_v0 }
 0x5b8   : > { %v1160_v3 = vpop.f32.mrb[4].mxu0  ;;  %v1206_v4 = vpop.f32.mrb[16].mxu1 }
 0x5b9   : > { %v1983_v5 = vpop.f32.mrb[5].mxu0  ;;  %v1989_v6 = vpop.f32.mrb[17].mxu1 }
 0x5ba   : > { %v1163_v57 = vpop.f32.mrb[6].mxu0  ;;  %v1209_v7 = vpop.f32.mrb[18].mxu1 }
 0x5bb   : > { %v1984_v8 = vpop.f32.mrb[7].mxu0  ;;  %v1990_v9 = vpop.f32.mrb[19].mxu1 }
 0x5d8   : > { %v1298_v10 = vpop.f32.mrb[20].mxu1 }
 0x5d9   : > { %v1320_v11 = vcombine.low %v1206_v4, %v1298_v10  ;;  %v1321_v12 = vcombine.high %v1206_v4, %v1298_v10  ;;  %v2001_v13 = vpop.f32.mrb[21].mxu1  ;;  %v2127_v4 = vld [vmem:[%s2744_s5 + $0x10] sm:$0xff]   ;;  %v2128_v10 = vld [vmem:[%s2744_s5 + $0x18] sm:$0xff]  }
 0x5da   : > { %v1301_v14 = vpop.f32.mrb[22].mxu1  ;;  %v2132_v13 = vld [vmem:[%s2744_s5 + $0x38] sm:$0xff]  }
 0x5db   : > { %v2002_v59 = vpop.f32.mrb[23].mxu1  ;;  %v1328_v24 = vrot.slane %v1320_v11, %v2468_v34  ;;  %v1335_v25 = vrot.slane %v1321_v12, %v2468_v34  ;;  %v2129_v11 = vld [vmem:[%s2744_s5 + $0x20] sm:$0xff]   ;;  %v2131_v12 = vld [vmem:[%s2744_s5 + $0x30] sm:$0xff]  }
 0x5dc   : > { %v2133_v14 = vld [vmem:[%s2745_s6] sm:$0xff]   ;;  %v2134_v59 = vld [vmem:[%s2745_s6 + $0x8] sm:$0xff]  }
 0x5e0   : > { %v1252_v15 = vpop.f32.mrb[8].mxu0 }
 0x5e1   : > { %v1304_v16 = vcombine.low %v1160_v3, %v1252_v15  ;;  %v1305_v18 = vcombine.high %v1160_v3, %v1252_v15  ;;  %v1995_v19 = vpop.f32.mrb[9].mxu0  ;;  %v2126_v3 = vld [vmem:[%s2744_s5 + $0x8] sm:$0xff]   ;;  %v2135_v15 = vld [vmem:[%s2745_s6 + $0x10] sm:$0xff]  }
 0x5e2   : > { %v1255_v20 = vpop.f32.mrb[10].mxu0  ;;  %2014 = vmatpush3.bf16.msra.mxu1 %v2126_v3  ;;  %v2138_v19 = vld [vmem:[%s2745_s6 + $0x28] sm:$0xff]  }
 0x5e3   : > { %v1312_v26 = vrot.slane %v1304_v16, %v2468_v34  ;;  %v1319_v27 = vrot.slane %v1305_v18, %v2468_v34  ;;  %v1996_v28 = vpop.f32.mrb[11].mxu0  ;;  %2015 = vmatprep.subr.bf16.mxu1 %v2260_v0  ;;  %v2136_v16 = vld [vmem:[%s2745_s6 + $0x18] sm:$0xff]   ;;  %v2137_v18 = vld [vmem:[%s2745_s6 + $0x20] sm:$0xff]   ;;  %v2139_v20 = vld [vmem:[%s2745_s6 + $0x30] sm:$0xff]  }
 0x5e5   : > { %v1336_v30 = vcombine.low %v1312_v26, %v1328_v24  ;;  %v1337_v31 = vcombine.high %v1312_v26, %v1328_v24  ;;  %v1352_v32 = vcombine.low %v1319_v27, %v1335_v25  ;;  %v1353_v33 = vcombine.high %v1319_v27, %v1335_v25 }
 0x5e6   : > { %2016 = vmatpush3.bf16.msra.mxu1 %v2127_v4 }
 0x5e7   : > { %v1344_v35 = vrot.slane %v1336_v30, %v2478_v44  ;;  %v1351_v36 = vrot.slane %v1337_v31, %v2478_v44  ;;  %v1360_v37 = vrot.slane %v1352_v32, %v2478_v44  ;;  %v1367_v38 = vrot.slane %v1353_v33, %v2478_v44  ;;  %2017 = vmatprep.subr.bf16.mxu1 %v2260_v0  ;;  %v2140_v30 = vld [vmem:[%s2745_s6 + $0x38] sm:$0xff]  }
 0x5e9   : > { %v1372_v40 = vcombine.low %v1344_v35, %v1351_v36  ;;  %v1864_v41 = vcombine.high %v1344_v35, %v1351_v36  ;;  %v1388_v42 = vcombine.low %v1360_v37, %v1367_v38  ;;  %v1865_v43 = vcombine.high %v1360_v37, %v1367_v38 }
 0x5ea   : > { %2018 = vmatpush3.bf16.msra.mxu1 %v2128_v10 }
 0x5eb   : > { %v1379_v45 = vrot.slane %v1372_v40, %v2468_v34  ;;  %v1387_v46 = vrot.slane %v1864_v41, %v2468_v34  ;;  %v1395_v47 = vrot.slane %v1388_v42, %v2468_v34  ;;  %v1403_v48 = vrot.slane %v1865_v43, %v2468_v34  ;;  %2019 = vmatprep.subr.bf16.mxu1 %v2260_v0 }
 0x5ed   : > { %v1405_v50 = vcombine.high %v1379_v45, %v1387_v46  ;;  %v1421_v17 = vcombine.high %v1395_v47, %v1403_v48  ;;  %v1404_v21 = vcombine.low %v1379_v45, %v1387_v46  ;;  %v1420_v52 = vcombine.low %v1395_v47, %v1403_v48 }
 0x5ee   : > { %2020 = vmatpush3.bf16.msra.mxu1 %v2129_v11 }
 0x5ef   : > { %v1419_v53 = vrot.slane %v1405_v50, %v2478_v44  ;;  %v1435_v54 = vrot.slane %v1421_v17, %v2478_v44  ;;  %v1412_v55 = vrot.slane %v1404_v21, %v2478_v44  ;;  %v1428_v56 = vrot.slane %v1420_v52, %v2478_v44  ;;  %2021 = vmatprep.subr.bf16.mxu1 %v2260_v0 }
 0x5f1   : > { %v1438_v49 = vcombine.low %v1419_v53, %v1435_v54  ;;  %v1437_v51 = vcombine.high %v1412_v55, %v1428_v56  ;;  %v1439_v58 = vcombine.high %v1419_v53, %v1435_v54  ;;  %v1436_v23 = vcombine.low %v1412_v55, %v1428_v56 }
 0x5f3   : > { %1445 = vrot.lane.b32.xlu1 %v1438_v49, %s2269_s21  ;;  %1441 = vrot.lane.b32.xlu0 %v1437_v51, %s2270_s22  ;;  %s2697_s21 = scalar_lea.hbm %s2746_s7, %s1886_s16  ;;  %s2189_s22 = scalar_lea.vmem %s2699_s18, 128 }
 0x5f4   : > { %p2190_p6 = scmp.ne.s32.totalorder %s2699_s18, %s2189_s22 }
 0x5f6   : > { %p2191_p10 = pnand %p2190_p6, %p2757_p9 }
 0x5f7   : > { %1449 = vrot.lane.b32.xlu1 %v1439_v58, %s2271_s23  ;;  %s2272_s23 = smov [#allocation5]  }
 0x5f8   : > { %p2192_p12 = pneg %p2191_p10  ;;  %s2193_s29 = sshll.u32 %s2272_s23, 4  ;;  %s2194_s29 = int_to_ptr.vmem [resolvable:$false] %s2193_s29 }
 0x5f9   : > { %s2195_s8 = scalar_lea.vmem %s2194_s29, 256  ;;  %p2196_p2 = scmp.lt.s32.totalorder %s2699_s18, %s2194_s29 }
 0x5fa   : > { %p2197_p3 = scmp.lt.s32.totalorder %s2195_s8, %s2189_s22 }
 0x5fc   : > { %p2198_p4 = por %p2197_p3, %p2196_p2 }
 0x5fe   : > { %p2199_p7 = pnand %p2198_p4, %p2192_p12 }
 0x665   : > { %v1446_v34 = vpop.permute.xlu1 %1445  ;;  %v1442_v22 = vpop.permute.xlu0 %1441 }
 0x666   : > { %v1452_v60 = vsel %vm871_vm1, %v1436_v23, %v1442_v22 }
 0x667   : > { %v1454_v62 = vsel %vm1453_vm3, %v1452_v60, %v1446_v34 }
 0x669   : > { %v1450_v61 = vpop.permute.xlu1 %1449 }
 0x66a   : > { %v1456_v63 = vsel %vm1455_vm4, %v1454_v62, %v1450_v61 }
 0x66b   : > { %v1457_v44 = vpack.c.bf16 %v1456_v63, %v1456_v63 }
 0x66d   : > { %2008 = vmatmul.mubr.msk.bf16.vlgmr.msra.gmra.mrb[12].mxu0 %vm1474_vm5, %v1457_v44 }
 0x66e   : > { %2047 = vmatprep.mubr.msk.bf16.mxu0 %vm2261_vm0, %v2260_v0  ;;  %2032 = vmatpush3.bf16.msra.mxu0 %v2133_v14 }
 0x66f   : > { %2033 = vmatprep.subr.bf16.mxu0 %v2260_v0 }
 0x672   : > { %2034 = vmatpush3.bf16.msra.mxu0 %v2134_v59 }
 0x673   : > { %2035 = vmatprep.subr.bf16.mxu0 %v2260_v0 }
 0x676   : > { %2036 = vmatpush3.bf16.msra.mxu0 %v2135_v15 }
 0x677   : > { %2037 = vmatprep.subr.bf16.mxu0 %v2260_v0 }
 0x67a   : > { %2038 = vmatpush3.bf16.msra.mxu0 %v2136_v16 }
 0x67b   : > { %2039 = vmatprep.subr.bf16.mxu0 %v2260_v0 }
 0x67e   : > { %2040 = vmatpush3.bf16.msra.mxu0 %v2137_v18 }
 0x67f   : > { %2041 = vmatprep.subr.bf16.mxu0 %v2260_v0 }
 0x682   : > { %2042 = vmatpush3.bf16.msra.mxu0 %v2138_v19 }
 0x683   : > { %2043 = vmatprep.subr.bf16.mxu0 %v2260_v0 }
 0x686   : > { %2044 = vmatpush3.bf16.msra.mxu0 %v2139_v20 }
 0x687   : > { %2045 = vmatprep.subr.bf16.mxu0 %v2260_v0 }
 0x68a   : > { %2046 = vmatpush3.bf16.msra.mxu0 %v2140_v30 }
 0x740   : > { %v1512_v5 = vpop.f32.mrb[12].mxu0 }
 0x741   : > { %v2636_v6 = vadd.f32 %v1512_v5, %v2406_v1  ;;  %v2009_v57 = vpop.f32.mrb[13].mxu0  ;;  %v2130_v1 = vld [vmem:[%s2744_s5 + $0x28] sm:$0xff]  }
 0x742   : > { %v1515_v7 = vpop.f32.mrb[14].mxu0  ;;  %2022 = vmatpush3.bf16.msra.mxu1 %v2130_v1 }
 0x743   : > { %v2010_v8 = vpop.f32.mrb[15].mxu0  ;;  %v1519_v9 = vmul.f32 %v2636_v6, %v2636_v6  ;;  %2023 = vmatprep.subr.bf16.mxu1 %v2260_v0 }
 0x745   : > { %1520 = vadd.xlane.f32.xlu0 %v1519_v9 }
 0x746   : > { %2024 = vmatpush3.bf16.msra.mxu1 %v2131_v12 }
 0x747   : > { %2025 = vmatprep.subr.bf16.mxu1 %v2260_v0 }
 0x74a   : > { %2026 = vmatpush3.bf16.msra.mxu1 %v2132_v13 }
 0x7d2   : > { %v1521_v24 = vpop.xlane.xlu0 %1520 }
 0x7d3   : > { %v1522_v25 = vmul.f32 0.03125, %v1521_v24 }
 0x7d5   : > { %v1523_v26 = vadd.f32 1e-06, %v1522_v25 }
 0x7d7   : > { %2159 = vrsqrt.f32 %v1523_v26 }
 0x7e1   : > { %v2160_v27 = vpop.eup %2159 }
 0x7e2   : > { %v1525_v28 = vmul.f32 %v2160_v27, %v2636_v6 }
 0x7e4   : > { %v1526_v29 = vpack.c.bf16 %v1525_v28, %v1525_v28 }
 0x7e6   : > { %2028 = vmatmul.mubr.bf16.vlgmr.msra.gmra.mrb[24].mxu1 %v1526_v29 }
 0x8b9   : > { %v1625_v31 = vpop.f32.mrb[24].mxu1 }
 0x8ba   : > { %v1631_v32 = vmax.f32 %v1625_v31, 0.0  ;;  %v2029_v33 = vpop.f32.mrb[25].mxu1 }
 0x8bb   : > { %v1628_v0 = vpop.f32.mrb[26].mxu1 }
 0x8bc   : > { %v1632_v35 = vpack.c.bf16 %v1631_v32, %v1631_v32  ;;  %v2030_v36 = vpop.f32.mrb[27].mxu1 }
 0x8be   : > { %2048 = vmatmul.mubr.bf16.vlgmr.msra.gmra.mrb[16].mxu0 %v1632_v35 }
 0x991   : > { %v1731_v37 = vpop.f32.mrb[16].mxu0 }
 0x992   : > { %v1737_v38 = vadd.f32 %v1731_v37, %v2636_v6  ;;  %v2049_v39 = vpop.f32.mrb[17].mxu0 }
 0x993   : > { %v1734_v40 = vpop.f32.mrb[18].mxu0 }
 0x994   : > { %1738 = vst [vmem:[%s295_s13] sm:$0xff] %v1737_v38  ;;  %v2050_v41 = vpop.f32.mrb[19].mxu0 }
 0x995   : > { %2202 = shalt.err (!%p2199_p7)
}
 0x996   : > { %s2203_s9 = scalar_lea.hbm %s2697_s21, 128  ;;  %s2207_s15 = scalar_lea.hbm %s2746_s7, 256 }
 0x997   : > { %p2204_p8 = scmp.ne.s32.totalorder %s2697_s21, %s2203_s9  ;;  %p2208_p1 = scmp.lt.u32.totalorder %s2697_s21, %s2746_s7 }
 0x998   : > { %p2209_p0 = scmp.lt.u32.totalorder %s2207_s15, %s2203_s9  ;;  %p2211_p6 = scmp.lt.u32.totalorder %s2203_s9, %s2697_s21 }
 0x999   : > { %p2205_p11 = pnand %p2204_p8, %p2757_p9 }
 0x99a   : > { %p2210_p5 = por %p2209_p0, %p2208_p1 }
 0x99b   : > { %p2206_p13 = pneg %p2205_p11 }
 0x99c   : > { %p2212_p10 = por %p2211_p6, %p2210_p5 }
 0x99e   : > { %p2213_p12 = pnand %p2212_p10, %p2206_p13 }
 0x9a0   : > { %2216 = shalt.err (!%p2213_p12)
}
 0x9a1   : > { %2055 = dma.vmem_to_hbm [thread:$0]  (%p2757_p9), %s2699_s18, 128, %s2697_s21, %s1740_s28  }
 0x9a2 PF: > { %p2067_p2 = scmp.ge.s32.totalorder %s2255_s27, 2  ;;  %s1765_s19 = sand.u32 1, %s2243_s24  }
 0x9a3   : > { %p2758_p3 = scmp.ne.s32.totalorder %s2751_s12, 0  ;;  %s1766_s20 = scalar_lea.sflag [#allocation4], %s1765_s19 }
 0x9a5   : > { %p2062_p4 = pnand %p2067_p2, %p2758_p3 }
 0x9a7   : > { %2238 = dma.done.wait (!%p2062_p4), %s1766_s20, 128  }
 0x9a8   : > { %2240 = vsyncadd (!%p2062_p4), %s1766_s20, 4294967168  ;;  %p18_p7 = scmp.ge.s32.totalorder %s2338_s30, 4   ;;  %s2759_s24 = smov %s2247_s25 }
 0x9a9   : > { %s2760_s25 = smov %s2251_s26  ;;  %s2761_s26 = smov %s2349_s10 }
 0x9aa   : > { %s2762_s27 = smov %s2338_s30  ;;  %20 = sbr.rel (!%p18_p7) target bundleno = 4 (0x4), region = 91 }
 0x9b1   :  { %1771 = vsyncpa [#allocation3], 1 }
 0x9b2   :  { %1773 = vsyncpa [#allocation3 + $0x1], 1 }
 0x9b3   :  { %1774 = vsyncpa [#allocation4], 1 }
 0x9b4   :  { %1776 = vsyncpa [#allocation4 + $0x1], 1 }

</bundles_post_ra>
